<compile_context>
chip_gen: v7x
topology: tpu7x:2x2x1
jax: 0.10.0
libtpu: 0.0.40
codegen_flags: <defaults>
</compile_context>

<pallas_src>
import functools

import jax
import jax.numpy as jnp
from jax.experimental import pallas as pl
from jax.experimental.pallas import tpu as pltpu

NUM_BINARY = 12
NUM_CONTINUOUS = 6
NUM_FEATURES = NUM_BINARY + NUM_CONTINUOUS             # 18

LANES = 1152                        # lcm(18, 128): lane-dense slab width
ROWS_PER_SLAB_ROW = LANES // NUM_FEATURES              # 64 batch rows / slab row
MAX_BLOCK_ROWS = 512                # multiple of 8 (and 16 for bf16 packing)


def _fused_elementwise(p, t, bm):
    """Per-element BCEWithLogits(p*bm, t*bm) + ((p-t)*(1-bm))**2, in f32."""
    x = p * bm
    z = t * bm
    # Numerically-stable BCE-with-logits; continuous lanes give log(2),
    # exactly as in the PyTorch module (its mean runs over all B*18 elems).
    bce = jnp.maximum(x, 0.0) - x * z + jnp.log(1.0 + jnp.exp(-jnp.abs(x)))
    d = (p - t) * (1.0 - bm)
    return bce + d * d


def _combined_loss_kernel(bm_ref, p_ref, t_ref, out_ref, acc_ref, *,
                          rows_valid, block_rows):
    i = pl.program_id(0)

    @pl.when(i == 0)
    def _init():
        acc_ref[...] = jnp.zeros_like(acc_ref)

    p = p_ref[...].astype(jnp.float32)          # (block_rows, LANES)
    t = t_ref[...].astype(jnp.float32)
    bm = bm_ref[...]                            # (1, LANES) {1., 0.} binary mask

    fused = _fused_elementwise(p, t, bm)

    # Partial last block (code emitted only when block_rows does not divide the
    # slab row count): out-of-bounds rows hold unspecified data -> select away.
    if rows_valid % block_rows != 0:
        row_i = jax.lax.broadcasted_iota(jnp.int32, (block_rows, LANES), 0)
        valid = (i * block_rows + row_i) < rows_valid
        fused = jnp.where(valid, fused, 0.0)

    acc_ref[...] += jnp.sum(fused, axis=0, keepdims=True)    # (1, LANES)

    @pl.when(i == pl.num_programs(0) - 1)
    def _finalize():
        # Splat the raw sum over the (8, 128) block: unmasked lane-dense store.
        out_ref[...] = jnp.full(out_ref.shape, jnp.sum(acc_ref[...]),
                                dtype=out_ref.dtype)


def _loss_sum_jax(predictions, targets):
    """Plain-JAX raw SUM of the fused per-element loss (tails / tiny batches)."""
    p = predictions.astype(jnp.float32)
    t = targets.astype(jnp.float32)
    bm = jnp.array([1.0] * NUM_BINARY + [0.0] * NUM_CONTINUOUS, jnp.float32)
    return jnp.sum(_fused_elementwise(p, t, bm))


def combined_differentiable_loss(predictions, targets, *,
                                 max_block_rows=MAX_BLOCK_ROWS):
    """Pallas TPU forward of CombinedDifferentiableLoss.  Returns scalar f32."""
    B, F = predictions.shape
    assert F == NUM_FEATURES, f"expected {NUM_FEATURES} features, got {F}"
    assert targets.shape == predictions.shape
    total = B * F

    rows_full = total // LANES                  # full lane-dense slab rows (B // 64)
    batch_main = rows_full * ROWS_PER_SLAB_ROW  # batch rows covered by the kernel

    # Tiny batches: launch + tile overhead dominates; plain JAX is faster.
    if rows_full < 8:
        return _loss_sum_jax(predictions, targets) / total

    # Adaptive tiling: one full-extent block when it fits, otherwise fixed
    # max_block_rows blocks with a (cheaply masked) partial last block.
    # No padding, no padded HBM copies.
    if rows_full <= max_block_rows:
        block_rows = rows_full                  # block dim == full array dim
        num_blocks = 1
    else:
        block_rows = max_block_rows
        num_blocks = pl.cdiv(rows_full, block_rows)

    if batch_main == B:                         # free bitcast of contiguous data
        p_main = predictions.reshape(rows_full, LANES)
        t_main = targets.reshape(rows_full, LANES)
    else:                                       # contiguous prefix; tail done in JAX
        p_main = predictions[:batch_main].reshape(rows_full, LANES)
        t_main = targets[:batch_main].reshape(rows_full, LANES)

    # Per-lane binary mask, passed once (constant index_map -> single fetch).
    bm = jnp.tile(
        jnp.array([1.0] * NUM_BINARY + [0.0] * NUM_CONTINUOUS, jnp.float32),
        ROWS_PER_SLAB_ROW).reshape(1, LANES)

    kernel = functools.partial(_combined_loss_kernel,
                               rows_valid=rows_full, block_rows=block_rows)

    n_main = rows_full * LANES
    bytes_accessed = int(p_main.size * p_main.dtype.itemsize
                         + t_main.size * t_main.dtype.itemsize
                         + bm.size * 4 + 8 * 128 * 4)

    out = pl.pallas_call(
        kernel,
        out_shape=jax.ShapeDtypeStruct((8, 128), jnp.float32),
        grid_spec=pltpu.PrefetchScalarGridSpec(
            num_scalar_prefetch=0,
            grid=(num_blocks,),
            in_specs=[
                pl.BlockSpec((1, LANES), lambda i: (0, 0)),            # mask
                pl.BlockSpec((block_rows, LANES), lambda i: (i, 0)),   # preds
                pl.BlockSpec((block_rows, LANES), lambda i: (i, 0)),   # targets
            ],
            out_specs=pl.BlockSpec((8, 128), lambda i: (0, 0)),
            scratch_shapes=[pltpu.VMEM((1, LANES), jnp.float32)],
        ),
        compiler_params=pltpu.CompilerParams(
            dimension_semantics=("arbitrary",)),
        cost_estimate=pl.CostEstimate(
            flops=12 * n_main,
            transcendentals=2 * n_main,
            bytes_accessed=bytes_accessed),
    )(bm, p_main, t_main)

    main_sum = out[0, 0]
    if batch_main < B:                          # < 64 batch rows done in plain JAX
        main_sum = main_sum + _loss_sum_jax(predictions[batch_main:],
                                            targets[batch_main:])
    # mean(BCE) + mean(MSE) over the same B*18 elements == fused sum / total.
    return main_sum / total


def _reference_loss(predictions, targets):
    """Plain-JAX reference mirroring the PyTorch module (BCE mean + MSE mean)."""
    p = predictions.astype(jnp.float32)
    t = targets.astype(jnp.float32)
    bm = jnp.array([1.0] * NUM_BINARY + [0.0] * NUM_CONTINUOUS, jnp.float32)
    cm = 1.0 - bm
    x = p * bm
    z = t * bm
    bce = jnp.mean(jnp.maximum(x, 0.0) - x * z + jnp.log(1.0 + jnp.exp(-jnp.abs(x))))
    mse = jnp.mean(((p - t) * cm) ** 2)
    return bce + mse


def _make_inputs(key, batch):
    kp, kb, kc = jax.random.split(key, 3)
    preds = jax.random.normal(kp, (batch, NUM_FEATURES), dtype=jnp.float32)
    bin_t = (jax.random.uniform(kb, (batch, NUM_BINARY)) > 0.5).astype(jnp.float32)
    cont_t = jax.random.normal(kc, (batch, NUM_CONTINUOUS), dtype=jnp.float32)
    return preds, jnp.concatenate([bin_t, cont_t], axis=1)


if __name__ == "__main__":
    root = jax.random.PRNGKey(0)
    k0, k1, k2 = jax.random.split(root, 3)

    # 1) Tiny batch -> plain-JAX fallback path.
    p, t = _make_inputs(k0, 8)
    got = jax.block_until_ready(combined_differentiable_loss(p, t))
    ref = jax.block_until_ready(_reference_loss(p, t))
    assert jnp.allclose(got, ref, rtol=1e-5, atol=1e-5), (got, ref)

    # 2) Single-block Pallas path (B multiple of 64: no tail, no masking).
    p, t = _make_inputs(k1, 512)
    got = jax.block_until_ready(combined_differentiable_loss(p, t))
    ref = jax.block_until_ready(_reference_loss(p, t))
    assert jnp.allclose(got, ref, rtol=1e-5, atol=1e-5), (got, ref)

    # 3) Multi-block accumulation + partial last block + plain-JAX batch tail,
    #    exercised at a small size by shrinking max_block_rows.
    p, t = _make_inputs(k2, 8392)            # 131 slab rows + 8-batch-row tail
    got = jax.block_until_ready(
        combined_differentiable_loss(p, t, max_block_rows=64))
    ref = jax.block_until_ready(_reference_loss(p, t))
    assert jnp.allclose(got, ref, rtol=1e-4, atol=1e-5), (got, ref)

    print("KERNEL_OK")
</pallas_src>

<mosaic_0001>
module attributes {stable_mosaic.version = 11 : i64} {
  func.func @_combined_loss_kernel(%arg0: i32, %arg1: memref<1x1152xf32, #tpu.memory_space<vmem>>, %arg2: memref<8x1152xf32, #tpu.memory_space<vmem>>, %arg3: memref<8x1152xf32, #tpu.memory_space<vmem>>, %arg4: memref<8x128xf32, #tpu.memory_space<vmem>>, %arg5: memref<1x1152xf32, #tpu.memory_space<vmem>>) attributes {dimension_semantics = [#tpu.dimension_semantics<arbitrary>], iteration_bounds = array<i64: 1>, scalar_prefetch = 0 : i64, scratch_operands = 1 : i64, tpu.core_type = #tpu.core_type<tc>, window_params = [{pipeline_mode = #tpu.pipeline_mode<synchronous>, transform_indices = @transform_0, window_bounds = array<i64: 1, 1152>}, {transform_indices = @transform_1, window_bounds = array<i64: 8, 1152>}, {transform_indices = @transform_2, window_bounds = array<i64: 8, 1152>}, {pipeline_mode = #tpu.pipeline_mode<synchronous>, transform_indices = @transform_3, window_bounds = array<i64: 8, 128>}]} {
    %c0_i32 = arith.constant 0 : i32
    %0 = arith.cmpi eq, %arg0, %c0_i32 : i32
    %1 = arith.extui %0 : i1 to i32
    %c0_i32_0 = arith.constant 0 : i32
    %2 = arith.cmpi ne, %1, %c0_i32_0 : i32
    scf.if %2 {
      %cst_16 = arith.constant 0.000000e+00 : f32
      %37 = vector.broadcast %cst_16 : f32 to vector<1x1152xf32>
      %c0_17 = arith.constant 0 : index
      %c0_18 = arith.constant 0 : index
      %38 = vector.load %arg5[%c0_17, %c0_18] : memref<1x1152xf32, #tpu.memory_space<vmem>>, vector<1x1152xf32>
      tpu.vector_store %arg5[%c0_17, %c0_18], %37 {strides = array<i32>} : memref<1x1152xf32, #tpu.memory_space<vmem>>, vector<1x1152xf32>,
    } else {
    }
    %c0 = arith.constant 0 : index
    %c0_1 = arith.constant 0 : index
    %3 = vector.load %arg2[%c0, %c0_1] : memref<8x1152xf32, #tpu.memory_space<vmem>>, vector<8x1152xf32>
    %c0_2 = arith.constant 0 : index
    %c0_3 = arith.constant 0 : index
    %4 = vector.load %arg3[%c0_2, %c0_3] : memref<8x1152xf32, #tpu.memory_space<vmem>>, vector<8x1152xf32>
    %c0_4 = arith.constant 0 : index
    %c0_5 = arith.constant 0 : index
    %5 = vector.load %arg1[%c0_4, %c0_5] : memref<1x1152xf32, #tpu.memory_space<vmem>>, vector<1x1152xf32>
    %6 = vector.broadcast %5 : vector<1x1152xf32> to vector<8x1152xf32>
    %7 = arith.mulf %3, %6 : vector<8x1152xf32>
    %8 = vector.broadcast %5 : vector<1x1152xf32> to vector<8x1152xf32>
    %9 = arith.mulf %4, %8 : vector<8x1152xf32>
    %cst = arith.constant 0.000000e+00 : f32
    %10 = vector.broadcast %cst : f32 to vector<8x1152xf32>
    %11 = arith.maximumf %7, %10 : vector<8x1152xf32>
    %12 = arith.mulf %7, %9 : vector<8x1152xf32>
    %13 = arith.subf %11, %12 : vector<8x1152xf32>
    %14 = math.absf %7 : vector<8x1152xf32>
    %cst_6 = arith.constant 0.000000e+00 : f32
    %15 = vector.broadcast %cst_6 : f32 to vector<8x1152xf32>
    %16 = arith.subf %15, %14 : vector<8x1152xf32>
    %17 = math.exp %16 : vector<8x1152xf32>
    %cst_7 = arith.constant 1.000000e+00 : f32
    %18 = vector.broadcast %cst_7 : f32 to vector<8x1152xf32>
    %19 = arith.addf %18, %17 : vector<8x1152xf32>
    %20 = math.log %19 : vector<8x1152xf32>
    %21 = arith.addf %13, %20 : vector<8x1152xf32>
    %22 = arith.subf %3, %4 : vector<8x1152xf32>
    %cst_8 = arith.constant 1.000000e+00 : f32
    %23 = vector.broadcast %cst_8 : f32 to vector<1x1152xf32>
    %24 = arith.subf %23, %5 : vector<1x1152xf32>
    %25 = vector.broadcast %24 : vector<1x1152xf32> to vector<8x1152xf32>
    %26 = arith.mulf %22, %25 : vector<8x1152xf32>
    %27 = arith.mulf %26, %26 : vector<8x1152xf32>
    %28 = arith.addf %21, %27 : vector<8x1152xf32>
    %c0_9 = arith.constant 0 : index
    %c0_10 = arith.constant 0 : index
    %29 = vector.load %arg5[%c0_9, %c0_10] : memref<1x1152xf32, #tpu.memory_space<vmem>>, vector<1x1152xf32>
    %cst_11 = arith.constant dense<0.000000e+00> : vector<1152xf32>
    %30 = vector.multi_reduction <add>, %28, %cst_11 [0] : vector<8x1152xf32> to vector<1152xf32>
    %31 = vector.shape_cast %30 : vector<1152xf32> to vector<1x1152xf32>
    %32 = arith.addf %29, %31 : vector<1x1152xf32>
    %c0_12 = arith.constant 0 : index
    %c0_13 = arith.constant 0 : index
    %33 = vector.load %arg5[%c0_12, %c0_13] : memref<1x1152xf32, #tpu.memory_space<vmem>>, vector<1x1152xf32>
    tpu.vector_store %arg5[%c0_12, %c0_13], %32 {strides = array<i32>} : memref<1x1152xf32, #tpu.memory_space<vmem>>, vector<1x1152xf32>,
    %c0_i32_14 = arith.constant 0 : i32
    %34 = arith.cmpi eq, %arg0, %c0_i32_14 : i32
    %35 = arith.extui %34 : i1 to i32
    %c0_i32_15 = arith.constant 0 : i32
    %36 = arith.cmpi ne, %35, %c0_i32_15 : i32
    scf.if %36 {
      %c0_16 = arith.constant 0 : index
      %c0_17 = arith.constant 0 : index
      %37 = vector.load %arg5[%c0_16, %c0_17] : memref<1x1152xf32, #tpu.memory_space<vmem>>, vector<1x1152xf32>
      %38 = vector.shape_cast %37 : vector<1x1152xf32> to vector<1x1x1152xf32>
      %cst_18 = arith.constant dense<0.000000e+00> : vector<1xf32>
      %39 = vector.multi_reduction <add>, %38, %cst_18 [1, 2] : vector<1x1x1152xf32> to vector<1xf32>
      %40 = vector.shape_cast %39 : vector<1xf32> to vector<1x1x1xf32>
      %41 = vector.extract %40[0, 0, 0] : f32 from vector<1x1x1xf32>
      %42 = vector.broadcast %41 : f32 to vector<8x128xf32>
      %c0_19 = arith.constant 0 : index
      %c0_20 = arith.constant 0 : index
      %43 = vector.load %arg4[%c0_19, %c0_20] : memref<8x128xf32, #tpu.memory_space<vmem>>, vector<8x128xf32>
      tpu.vector_store %arg4[%c0_19, %c0_20], %42 {strides = array<i32>} : memref<8x128xf32, #tpu.memory_space<vmem>>, vector<8x128xf32>,
    } else {
    }
    return
  }
  func.func @transform_0(%arg0: i32) -> (i32, i32) {
    %c0_i32 = arith.constant 0 : i32
    %c0_i32_0 = arith.constant 0 : i32
    %c0_i32_1 = arith.constant 0 : i32
    return %c0_i32, %c0_i32_0 : i32, i32
  }
  func.func @transform_1(%arg0: i32) -> (i32, i32) {
    %c0_i32 = arith.constant 0 : i32
    %c0_i32_0 = arith.constant 0 : i32
    return %arg0, %c0_i32 : i32, i32
  }
  func.func @transform_2(%arg0: i32) -> (i32, i32) {
    %c0_i32 = arith.constant 0 : i32
    %c0_i32_0 = arith.constant 0 : i32
    return %arg0, %c0_i32 : i32, i32
  }
  func.func @transform_3(%arg0: i32) -> (i32, i32) {
    %c0_i32 = arith.constant 0 : i32
    %c0_i32_0 = arith.constant 0 : i32
    %c0_i32_1 = arith.constant 0 : i32
    return %c0_i32, %c0_i32_0 : i32, i32
  }
}

</mosaic_0001>

<bundles_post_ra>
// kernel: tpu_custom_call.1
= control target key start
LH: loop header
LB: loop body
LE: loop exit
PB: predicated region body
PF: predicated region fallthrough
CT: control target
= control target key end

     0   :  { %8 = vsyncpa [#allocation4], 0  ;;  %s1054_s0 = inlined_call_operand.hbm [shape: f32[1,1152], index: 0, kind: input, shape index: {}]   ;;  %s1055_s1 = inlined_call_operand.hbm [shape: f32[8,1152], index: 1, kind: input, shape index: {}]   ;;  %s1056_s2 = inlined_call_operand.hbm [shape: f32[8,1152], index: 2, kind: input, shape index: {}]   ;;  %s1057_s3 = inlined_call_operand.hbm [shape: f32[8,128], index: 3, kind: output, shape index: {}]  }
   0x1   :  { %9 = vsyncpa [#allocation7], 0 }
   0x2   :  { %10 = vsyncpa [#allocation5], 0  ;;  %s703_s12 = smov [#allocation6]   ;;  %s704_s14 = smov [#allocation3]  }
   0x3   :  { %s27_s13 = sshll.u32 %s703_s12, 4  ;;  %s17_s15 = sshll.u32 %s704_s14, 4  ;;  %s28_s13 = int_to_ptr.vmem [resolvable:$true] %s27_s13  ;;  %s18_s15 = int_to_ptr.vmem [resolvable:$true] %s17_s15 }
   0x4   :  { %s609_s18 = scalar_lea.hbm %s1055_s1, 1152 }
   0x5   :  { %p610_p0 = scmp.ne.s32.totalorder %s1055_s1, %s609_s18  ;;  %p613_p1 = scmp.lt.u32.totalorder %s609_s18, %s1055_s1 }
   0x7   :  { %p615_p2 = pnand %p613_p1, %p610_p0 }
   0x9   :  { %618 = shalt.err (!%p615_p2)
}
   0xa   :  { %s619_s23 = scalar_lea.vmem %s28_s13, 1152  ;;  %p624_p4 = scmp.lt.s32.totalorder %s28_s13, %s28_s13 }
   0xb   :  { %p620_p3 = scmp.ne.s32.totalorder %s28_s13, %s619_s23  ;;  %p625_p5 = scmp.lt.s32.totalorder %s619_s23, %s619_s23 }
   0xd   :  { %p626_p6 = por %p625_p5, %p624_p4 }
   0xf   :  { %p627_p7 = pnand %p626_p6, %p620_p3 }
  0x11   :  { %630 = shalt.err (!%p627_p7)
}
  0x12   :  { %30 = dma.hbm_to_vmem [thread:$0]  %s1055_s1, 1152, %s28_s13, [#allocation7]  }
  0x13   :  { %s631_s28 = scalar_lea.hbm %s1054_s0, 144 }
  0x14   :  { %p632_p8 = scmp.ne.s32.totalorder %s1054_s0, %s631_s28  ;;  %p635_p9 = scmp.lt.u32.totalorder %s631_s28, %s1054_s0 }
  0x16   :  { %p637_p10 = pnand %p635_p9, %p632_p8 }
  0x18   :  { %640 = shalt.err (!%p637_p10)
}
  0x19   :  { %s641_s6 = scalar_lea.vmem %s18_s15, 144  ;;  %s645_s7 = scalar_lea.vmem %s18_s15, 160 }
  0x1a   :  { %p642_p11 = scmp.ne.s32.totalorder %s18_s15, %s641_s6  ;;  %p646_p12 = scmp.lt.s32.totalorder %s18_s15, %s18_s15 }
  0x1b   :  { %p647_p13 = scmp.lt.s32.totalorder %s645_s7, %s641_s6 }
  0x1d   :  { %p648_p0 = por %p647_p13, %p646_p12 }
  0x1f   :  { %p649_p1 = pnand %p648_p0, %p642_p11 }
  0x21   :  { %652 = shalt.err (!%p649_p1)
}
  0x22   :  { %20 = dma.hbm_to_vmem [thread:$0]  %s1054_s0, 144, %s18_s15, [#allocation4]  }
  0x23   :  { %s705_s9 = smov [#allocation8]   ;;  %s653_s13 = scalar_lea.hbm %s1056_s2, 1152 }
  0x24   :  { %s37_s10 = sshll.u32 %s705_s9, 4  ;;  %p654_p2 = scmp.ne.s32.totalorder %s1056_s2, %s653_s13  ;;  %s38_s10 = int_to_ptr.vmem [resolvable:$true] %s37_s10 }
  0x25   :  { %p657_p3 = scmp.lt.u32.totalorder %s653_s13, %s1056_s2 }
  0x27   :  { %p659_p4 = pnand %p657_p3, %p654_p2 }
  0x29   :  { %662 = shalt.err (!%p659_p4)
}
  0x2a   :  { %s663_s19 = scalar_lea.vmem %s38_s10, 1152  ;;  %p668_p6 = scmp.lt.s32.totalorder %s38_s10, %s38_s10 }
  0x2b   :  { %p664_p5 = scmp.ne.s32.totalorder %s38_s10, %s663_s19  ;;  %p669_p7 = scmp.lt.s32.totalorder %s663_s19, %s663_s19 }
  0x2d   :  { %p670_p8 = por %p669_p7, %p668_p6 }
  0x2f   :  { %p671_p9 = pnand %p670_p8, %p664_p5 }
  0x31   :  { %674 = shalt.err (!%p671_p9)
}
  0x32   :  { %40 = dma.hbm_to_vmem [thread:$0]  %s1056_s2, 1152, %s38_s10, [#allocation7]  }
  0x33   :  { %697 = dma.done.wait [#allocation4], 144  }
  0x34   :  { %698 = vsyncadd [#allocation4], 4294967152 }
  0x35   :  { %699 = dma.done.wait [#allocation7], 2304  }
  0x36   :  { %700 = vsyncadd [#allocation7], 4294964992  ;;  %v55_v0 = vlaneseq  ;;  %v1064_v1 = vmov 0  ;;  %v706_v2 = vmov 0.0   ;;  %v779_v6 = vld [vmem:[#allocation3] sm:$0xff]  ;;  %v809_v16 = vld [vmem:[#allocation6] sm:$0xff] }
  0x37   :  { %v799_v13 = vld [vmem:[#allocation3 + $0x8] sm:$0x1]  ;;  %v811_v17 = vld [vmem:[#allocation6 + $0x8] sm:$0xff]  ;;  %v825_v21 = vld [vmem:[#allocation6 + $0x10] sm:$0xff]  ;;  %v707_v40 = vmov 1966171168  }
  0x38   :  { %vm765_vm0 = vcmp.lt.s32.totalorder %v55_v0, 128  ;;  %v771_v3 = vshrl.u32 %v55_v0, 7  ;;  %v827_v22 = vld [vmem:[#allocation6 + $0x18] sm:$0xff]  ;;  %v829_v23 = vld [vmem:[#allocation6 + $0x20] sm:$0xff]  ;;  %v843_v27 = vld [vmem:[#allocation6 + $0x28] sm:$0xff]  ;;  %v399_v41 = vunpack.c.l.s4 %v707_v40  ;;  %vm519_vm1 = vcmask 1040384  }
  0x39   :  { %v1065_v1 = vsel %vm765_vm0, 4294967295, %v1064_v1  ;;  %59 = vst.msk [vmem:[#allocation2 + $0x8] sm:$0x1] %vm765_vm0, %v706_v2  ;;  %v845_v28 = vld [vmem:[#allocation6 + $0x30] sm:$0xff]  ;;  %v847_v29 = vld [vmem:[#allocation6 + $0x38] sm:$0xff]  ;;  %v853_v31 = vld [vmem:[#allocation6 + $0x40] sm:$0xff] }
  0x3a   :  { %1066 = vst [vmem:[#allocation13_spill] sm:$0xff] %v1065_v1  ;;  %v774_v4 = vsub.s32 0, %v771_v3  ;;  %v777_v5 = vsub.s32 1, %v771_v3  ;;  %v782_v7 = vsub.s32 2, %v771_v3  ;;  %v785_v8 = vsub.s32 3, %v771_v3  ;;  %1067 = vst [vmem:[#allocation14_spill] sm:$0xff] %v847_v29 }
  0x3b   :  { %v788_v9 = vsub.s32 4, %v771_v3  ;;  %v791_v10 = vsub.s32 5, %v771_v3  ;;  %v794_v11 = vsub.s32 6, %v771_v3  ;;  %v797_v12 = vsub.s32 7, %v771_v3  ;;  %1068 = vst [vmem:[#allocation15_spill] sm:$0xff] %v853_v31  ;;  %v900_v2 = vld [vmem:[#allocation8] sm:$0xff] }
  0x3c   :  { %v803_v14 = vrot.slane %v779_v6, %v774_v4  ;;  %v807_v15 = vrot.slane %v779_v6, %v777_v5  ;;  %v815_v18 = vrot.slane %v779_v6, %v782_v7  ;;  %v819_v19 = vrot.slane %v779_v6, %v785_v8  ;;  %v902_v40 = vld [vmem:[#allocation8 + $0x8] sm:$0xff]  ;;  %s708_s2 = smov [#allocation9]  }
  0x3d   :  { %v823_v20 = vrot.slane %v779_v6, %v788_v9  ;;  %v833_v24 = vrot.slane %v779_v6, %v791_v10  ;;  %v837_v25 = vrot.slane %v779_v6, %v794_v11  ;;  %v841_v26 = vrot.slane %v779_v6, %v797_v12  ;;  %s554_s20 = sshll.u32 %s708_s2, 4  ;;  %s555_s20 = int_to_ptr.vmem [resolvable:$true] %s554_s20 }
  0x3e   :  { %v851_v30 = vrot.slane %v799_v13, %v774_v4  ;;  %v857_v32 = vmul.f32 %v803_v14, %v809_v16  ;;  %v861_v33 = vmul.f32 %v807_v15, %v811_v17  ;;  %v865_v34 = vmul.f32 %v815_v18, %v825_v21  ;;  %s675_s22 = scalar_lea.vmem %s555_s20, 128  ;;  %p680_p11 = scmp.lt.s32.totalorder %s555_s20, %s555_s20 }
  0x3f   :  { %v869_v35 = vmul.f32 %v819_v19, %v827_v22  ;;  %v873_v36 = vmul.f32 %v823_v20, %v829_v23  ;;  %v877_v37 = vmul.f32 %v833_v24, %v843_v27  ;;  %v881_v38 = vmul.f32 %v837_v25, %v845_v28  ;;  %p676_p10 = scmp.ne.s32.totalorder %s555_s20, %s675_s22  ;;  %p681_p12 = scmp.lt.s32.totalorder %s675_s22, %s675_s22 }
  0x40   :  { %v885_v39 = vmul.f32 %v841_v26, %v847_v29  ;;  %v889_v42 = vmul.f32 %v851_v30, %v853_v31  ;;  %v172_v43 = vand.u32 2147483647, %v857_v32  ;;  %v173_v44 = vand.u32 2147483647, %v861_v33 }
  0x41   :  { %v174_v45 = vand.u32 2147483647, %v865_v34  ;;  %v175_v46 = vand.u32 2147483647, %v869_v35  ;;  %v176_v47 = vand.u32 2147483647, %v873_v36  ;;  %v400_v51 = vunpack.c.0.s8 %v399_v41  ;;  %p682_p13 = por %p681_p12, %p680_p11 }
  0x42   :  { %v177_v48 = vand.u32 2147483647, %v877_v37  ;;  %v178_v49 = vand.u32 2147483647, %v881_v38  ;;  %v179_v50 = vand.u32 2147483647, %v885_v39 }
  0x43   :  { %v180_v52 = vand.u32 2147483647, %v889_v42  ;;  %v181_v53 = vsub.f32 0.0, %v172_v43  ;;  %v182_v54 = vsub.f32 0.0, %v173_v44  ;;  %v183_v55 = vsub.f32 0.0, %v174_v45  ;;  %v907_v44 = vld [vmem:[#allocation8 + $0x10] sm:$0xff]  ;;  %p683_p0 = pnand %p682_p13, %p676_p10 }
  0x44   :  { %v184_v56 = vsub.f32 0.0, %v175_v46  ;;  %v185_v57 = vsub.f32 0.0, %v176_v47  ;;  %v186_v58 = vsub.f32 0.0, %v177_v48  ;;  %v187_v59 = vsub.f32 0.0, %v178_v49  ;;  %v909_v45 = vld [vmem:[#allocation8 + $0x18] sm:$0xff]  ;;  %v915_v49 = vld [vmem:[#allocation8 + $0x20] sm:$0xff] }
  0x45   :  { %v190_v60 = vmul.f32 1.442695, %v181_v53  ;;  %v192_v61 = vmul.f32 1.442695, %v182_v54  ;;  %v188_v62 = vsub.f32 0.0, %v179_v50  ;;  %v189_v1 = vsub.f32 0.0, %v180_v52 }
  0x46   :  { %v194_v63 = vmul.f32 1.442695, %v183_v55  ;;  %v196_v0 = vmul.f32 1.442695, %v184_v56  ;;  %v198_v41 = vmul.f32 1.442695, %v185_v57  ;;  %v905_v43 = vsub.s32 %v400_v51, %v771_v3 }
  0x47   :  { %573 = vpow2.f32 %v190_v60  ;;  %v200_v46 = vmul.f32 1.442695, %v186_v58  ;;  %v917_v50 = vld [vmem:[#allocation8 + $0x28] sm:$0xff]  ;;  %v202_v52 = vmul.f32 1.442695, %v187_v59  ;;  %v923_v53 = vld [vmem:[#allocation8 + $0x30] sm:$0xff]  ;;  %v140_v60 = vmul.f32 %v823_v20, %v915_v49 }
  0x48   :  { %1069 = vst [vmem:[#allocation16_spill] sm:$0xff] %v905_v43  ;;  %575 = vpow2.f32 %v192_v61  ;;  %v925_v54 = vld [vmem:[#allocation8 + $0x38] sm:$0xff]  ;;  %v204_v55 = vmul.f32 1.442695, %v188_v62  ;;  %v931_v58 = vld [vmem:[#allocation8 + $0x40] sm:$0xff]  ;;  %v137_v62 = vmul.f32 %v807_v15, %v902_v40  ;;  %v142_v15 = vmul.f32 %v837_v25, %v923_v53 }
  0x49   :  { %577 = vpow2.f32 %v194_v63  ;;  %1070 = vst [vmem:[#allocation17_spill] sm:$0xff] %v925_v54  ;;  %1071 = vst [vmem:[#allocation18_spill] sm:$0xff] %v931_v58  ;;  %v206_v59 = vmul.f32 1.442695, %v189_v1  ;;  %v136_v63 = vmul.f32 %v803_v14, %v900_v2  ;;  %v139_v1 = vmul.f32 %v819_v19, %v909_v45 }
  0x4a   :  { %579 = vpow2.f32 %v196_v0  ;;  %v141_v14 = vmul.f32 %v833_v24, %v917_v50  ;;  %v145_v0 = vmax.f32 %v857_v32, 0.0  ;;  %v146_v19 = vmax.f32 %v861_v33, 0.0 }
  0x4b   :  { %581 = vpow2.f32 %v198_v41  ;;  %v138_v41 = vmul.f32 %v815_v18, %v907_v44  ;;  %v144_v18 = vmul.f32 %v851_v30, %v931_v58  ;;  %v147_v20 = vmax.f32 %v865_v34, 0.0 }
  0x4c   :  { %583 = vpow2.f32 %v200_v46  ;;  %v143_v46 = vmul.f32 %v841_v26, %v925_v54  ;;  %v149_v24 = vmax.f32 %v873_v36, 0.0  ;;  %v150_v25 = vmax.f32 %v877_v37, 0.0 }
  0x4d   :  { %585 = vpow2.f32 %v202_v52  ;;  %v148_v52 = vmax.f32 %v869_v35, 0.0  ;;  %v151_v26 = vmax.f32 %v881_v38, 0.0  ;;  %v154_v57 = vmul.f32 %v136_v63, %v857_v32 }
  0x4e   :  { %587 = vpow2.f32 %v204_v55  ;;  %v152_v55 = vmax.f32 %v885_v39, 0.0  ;;  %v156_v51 = vmul.f32 %v138_v41, %v865_v34  ;;  %v157_v3 = vmul.f32 %v139_v1, %v869_v35 }
  0x4f   :  { %589 = vpow2.f32 %v206_v59  ;;  %v155_v59 = vmul.f32 %v137_v62, %v861_v33  ;;  %v158_v43 = vmul.f32 %v140_v60, %v873_v36  ;;  %v159_v58 = vmul.f32 %v141_v14, %v877_v37 }
  0x50   :  { %v253_v54 = vsub.f32 1.0, %v779_v6  ;;  %v160_v30 = vmul.f32 %v142_v15, %v881_v38  ;;  %v161_v32 = vmul.f32 %v143_v46, %v885_v39  ;;  %v162_v34 = vmul.f32 %v144_v18, %v889_v42 }
  0x51   :  { %v574_v61 = vpop.eup %573  ;;  %v163_v35 = vsub.f32 %v145_v0, %v154_v57  ;;  %v164_v36 = vsub.f32 %v146_v19, %v155_v59  ;;  %v165_v60 = vsub.f32 %v147_v20, %v156_v51  ;;  %v254_v38 = vsub.f32 1.0, %v799_v13 }
  0x52   :  { %v576_v56 = vpop.eup %575  ;;  %v208_v48 = vadd.f32 1.0, %v574_v61  ;;  %v260_v39 = vrot.slane %v253_v54, %v774_v4  ;;  %v264_v41 = vrot.slane %v253_v54, %v777_v5  ;;  %v272_v51 = vrot.slane %v253_v54, %v785_v8 }
  0x53   :  { %v578_v47 = vpop.eup %577  ;;  %v209_v31 = vadd.f32 1.0, %v576_v56  ;;  %v276_v0 = vrot.slane %v253_v54, %v788_v9  ;;  %v280_v13 = vrot.slane %v253_v54, %v791_v10  ;;  %v284_v14 = vrot.slane %v253_v54, %v794_v11 }
  0x54   :  { %v580_v29 = vpop.eup %579  ;;  %v210_v63 = vadd.f32 1.0, %v578_v47  ;;  %591 = vlog2.f32 %v208_v48  ;;  %v166_v15 = vsub.f32 %v148_v52, %v157_v3  ;;  %v288_v46 = vrot.slane %v253_v54, %v797_v12 }
  0x55   :  { %v582_v33 = vpop.eup %581  ;;  %v211_v61 = vadd.f32 1.0, %v580_v29  ;;  %593 = vlog2.f32 %v209_v31  ;;  %v268_v29 = vrot.slane %v253_v54, %v782_v7  ;;  %v1072_v18 = vsub.f32 %v809_v16, %v900_v2 }
  0x56   :  { %v584_v62 = vpop.eup %583  ;;  %v212_v37 = vadd.f32 1.0, %v582_v33  ;;  %595 = vlog2.f32 %v210_v63  ;;  %v292_v20 = vrot.slane %v254_v38, %v774_v4  ;;  %v1073_v59 = vsub.f32 %v811_v17, %v902_v40 }
  0x57   :  { %v586_v56 = vpop.eup %585  ;;  %v213_v6 = vadd.f32 1.0, %v584_v62  ;;  %597 = vlog2.f32 %v211_v61  ;;  %v302_v19 = vmul.f32 %v260_v39, %v1072_v18  ;;  %v1074_v33 = vsub.f32 %v825_v21, %v907_v44 }
  0x58   :  { %v588_v47 = vpop.eup %587  ;;  %v214_v48 = vadd.f32 1.0, %v586_v56  ;;  %599 = vlog2.f32 %v212_v37  ;;  %v303_v63 = vmul.f32 %v264_v41, %v1073_v59  ;;  %v167_v62 = vsub.f32 %v149_v24, %v158_v43  ;;  %v1080_v24 = vld [vmem:[#allocation14_spill] sm:$0xff] }
  0x59   :  { %v590_v31 = vpop.eup %589  ;;  %v215_v57 = vadd.f32 1.0, %v588_v47  ;;  %601 = vlog2.f32 %v213_v6  ;;  %v304_v61 = vmul.f32 %v268_v29, %v1074_v33  ;;  %v168_v3 = vsub.f32 %v150_v25, %v159_v58  ;;  %v1081_v25 = vld [vmem:[#allocation17_spill] sm:$0xff] }
  0x5a   :  { %v216_v1 = vadd.f32 1.0, %v590_v31  ;;  %603 = vlog2.f32 %v214_v48  ;;  %v1075_v54 = vsub.f32 %v827_v22, %v909_v45  ;;  %v1076_v16 = vsub.f32 %v829_v23, %v915_v49 }
  0x5b   :  { %605 = vlog2.f32 %v215_v57  ;;  %v169_v56 = vsub.f32 %v151_v26, %v160_v30  ;;  %v170_v6 = vsub.f32 %v152_v55, %v161_v32  ;;  %v1077_v17 = vsub.f32 %v843_v27, %v917_v50  ;;  %v1083_v30 = vld [vmem:[#allocation15_spill] sm:$0xff]  ;;  %v1084_v32 = vld [vmem:[#allocation18_spill] sm:$0xff] }
  0x5c   :  { %607 = vlog2.f32 %v216_v1  ;;  %v305_v52 = vmul.f32 %v272_v51, %v1075_v54  ;;  %v306_v2 = vmul.f32 %v276_v0, %v1076_v16  ;;  %v1078_v21 = vsub.f32 %v845_v28, %v923_v53 }
  0x5d   :  { %v307_v40 = vmul.f32 %v280_v13, %v1077_v17  ;;  %v1079_v58 = vmax.f32 %v889_v42, 0.0  ;;  %v1082_v23 = vsub.f32 %v1080_v24, %v1081_v25  ;;  %v311_v38 = vmul.f32 %v302_v19, %v302_v19 }
  0x5e   :  { %v592_v37 = vpop.eup %591  ;;  %v308_v43 = vmul.f32 %v284_v14, %v1078_v21  ;;  %v1085_v27 = vsub.f32 %v1083_v30, %v1084_v32  ;;  %v312_v39 = vmul.f32 %v303_v63, %v303_v63  ;;  %v313_v47 = vmul.f32 %v304_v61, %v304_v61 }
  0x5f   :  { %v594_v44 = vpop.eup %593  ;;  %v171_v22 = vsub.f32 %v1079_v58, %v162_v34  ;;  %v218_v45 = vmul.f32 0.6931472, %v592_v37  ;;  %v309_v49 = vmul.f32 %v288_v46, %v1082_v23  ;;  %v314_v41 = vmul.f32 %v305_v52, %v305_v52 }
  0x60   :  { %v596_v26 = vpop.eup %595  ;;  %v220_v55 = vmul.f32 0.6931472, %v594_v44  ;;  %v310_v50 = vmul.f32 %v292_v20, %v1085_v27  ;;  %v315_v42 = vmul.f32 %v306_v2, %v306_v2  ;;  %v316_v57 = vmul.f32 %v307_v40, %v307_v40 }
  0x61   :  { %v598_v28 = vpop.eup %597  ;;  %v222_v53 = vmul.f32 0.6931472, %v596_v26  ;;  %v235_v48 = vadd.f32 %v218_v45, %v163_v35  ;;  %v317_v51 = vmul.f32 %v308_v43, %v308_v43  ;;  %v318_v14 = vmul.f32 %v309_v49, %v309_v49 }
  0x62   :  { %v600_v34 = vpop.eup %599  ;;  %v224_v29 = vmul.f32 0.6931472, %v598_v28  ;;  %v236_v31 = vadd.f32 %v220_v55, %v164_v36  ;;  %v319_v59 = vmul.f32 %v310_v50, %v310_v50 }
  0x63   :  { %v602_v0 = vpop.eup %601  ;;  %v226_v1 = vmul.f32 0.6931472, %v600_v34  ;;  %v237_v13 = vadd.f32 %v222_v53, %v165_v60  ;;  %v320_v46 = vadd.f32 %v311_v38, %v235_v48 }
  0x64   :  { %v604_v18 = vpop.eup %603  ;;  %v228_v19 = vmul.f32 0.6931472, %v602_v0  ;;  %v238_v20 = vadd.f32 %v224_v29, %v166_v15  ;;  %v321_v63 = vadd.f32 %v312_v39, %v236_v31 }
  0x65   :  { %v606_v33 = vpop.eup %605  ;;  %v230_v61 = vmul.f32 0.6931472, %v604_v18  ;;  %v239_v35 = vadd.f32 %v226_v1, %v167_v62  ;;  %v322_v54 = vadd.f32 %v313_v47, %v237_v13  ;;  %v331_v52 = vrot.slane %v320_v46, 4 }
  0x66   :  { %v608_v16 = vpop.eup %607  ;;  %v232_v2 = vmul.f32 0.6931472, %v606_v33  ;;  %v240_v36 = vadd.f32 %v228_v19, %v168_v3  ;;  %v323_v37 = vadd.f32 %v314_v41, %v238_v20  ;;  %v337_v17 = vrot.slane %v321_v63, 4 }
  0x67   :  { %v234_v40 = vmul.f32 0.6931472, %v608_v16  ;;  %v241_v21 = vadd.f32 %v230_v61, %v169_v56  ;;  %v324_v60 = vadd.f32 %v315_v42, %v239_v35  ;;  %v332_v43 = vadd.f32 %v331_v52, %v320_v46 }
  0x68   :  { %v242_v44 = vadd.f32 %v232_v2, %v170_v6  ;;  %v325_v58 = vadd.f32 %v316_v57, %v240_v36  ;;  %v338_v45 = vadd.f32 %v337_v17, %v321_v63  ;;  %v343_v15 = vrot.slane %v322_v54, 4 }
  0x69   :  { %v243_v24 = vadd.f32 %v234_v40, %v171_v22  ;;  %v326_v25 = vadd.f32 %v317_v51, %v241_v21  ;;  %v333_v23 = vrot.slane %v332_v43, 2  ;;  %v349_v49 = vrot.slane %v323_v37, 4 }
  0x6a   :  { %v327_v62 = vadd.f32 %v318_v14, %v242_v44  ;;  %v339_v38 = vrot.slane %v338_v45, 2  ;;  %v344_v26 = vadd.f32 %v343_v15, %v322_v54  ;;  %v355_v55 = vrot.slane %v324_v60, 4 }
  0x6b   :  { %v328_v30 = vadd.f32 %v319_v59, %v243_v24  ;;  %v334_v3 = vadd.f32 %v333_v23, %v332_v43  ;;  %v350_v32 = vadd.f32 %v349_v49, %v323_v37  ;;  %v361_v27 = vrot.slane %v325_v58, 4  ;;  %v1086_v37 = vld [vmem:[#allocation16_spill] sm:$0xff] }
  0x6c   :  { %v340_v50 = vadd.f32 %v339_v38, %v338_v45  ;;  %v345_v56 = vrot.slane %v344_v26, 2  ;;  %v356_v39 = vadd.f32 %v355_v55, %v324_v60  ;;  %v367_v47 = vrot.slane %v326_v25, 4 }
  0x6d   :  { %v335_v6 = vrot.slane %v334_v3, 1  ;;  %v351_v28 = vrot.slane %v350_v32, 2  ;;  %v362_v53 = vadd.f32 %v361_v27, %v325_v58  ;;  %v373_v48 = vrot.slane %v327_v62, 4 }
  0x6e   :  { %v341_v22 = vrot.slane %v340_v50, 1  ;;  %v346_v41 = vadd.f32 %v345_v56, %v344_v26  ;;  %v357_v42 = vrot.slane %v356_v39, 2  ;;  %v368_v34 = vadd.f32 %v367_v47, %v326_v25 }
  0x6f   :  { %v336_v29 = vadd.f32 %v335_v6, %v334_v3  ;;  %v352_v31 = vadd.f32 %v351_v28, %v350_v32  ;;  %v363_v57 = vrot.slane %v362_v53, 2  ;;  %v374_v51 = vadd.f32 %v373_v48, %v327_v62  ;;  %v330_v32 = vld [vmem:[#allocation2 + $0x8] sm:$0x1] }
  0x70   :  { %v342_v0 = vadd.f32 %v341_v22, %v340_v50  ;;  %v347_v1 = vrot.slane %v346_v41, 1  ;;  %v358_v13 = vadd.f32 %v357_v42, %v356_v39  ;;  %v369_v14 = vrot.slane %v368_v34, 2 }
  0x71   :  { %v353_v46 = vrot.slane %v352_v31, 1  ;;  %v364_v18 = vadd.f32 %v363_v57, %v362_v53  ;;  %v375_v19 = vrot.slane %v374_v51, 2  ;;  %v379_v20 = vrot.slane %v328_v30, 4 }
  0x72   :  { %v348_v59 = vadd.f32 %v347_v1, %v346_v41  ;;  %v359_v63 = vrot.slane %v358_v13, 1  ;;  %v370_v33 = vadd.f32 %v369_v14, %v368_v34  ;;  %v394_v61 = vcombine.low %v336_v29, %v342_v0 }
  0x73   :  { %v354_v35 = vadd.f32 %v353_v46, %v352_v31  ;;  %v365_v54 = vrot.slane %v364_v18, 1  ;;  %v376_v52 = vadd.f32 %v375_v19, %v374_v51  ;;  %v380_v16 = vadd.f32 %v379_v20, %v328_v30 }
  0x74   :  { %v360_v2 = vadd.f32 %v359_v63, %v358_v13  ;;  %v371_v36 = vrot.slane %v370_v33, 1  ;;  %v404_v17 = vrot.slane %v394_v61, %v1086_v37 }
  0x75   :  { %v366_v40 = vadd.f32 %v365_v54, %v364_v18  ;;  %v377_v21 = vrot.slane %v376_v52, 1  ;;  %v381_v60 = vrot.slane %v380_v16, 2  ;;  %v395_v43 = vcombine.low %v348_v59, %v354_v35 }
  0x76   :  { %v372_v44 = vadd.f32 %v371_v36, %v370_v33 }
  0x77   :  { %v378_v58 = vadd.f32 %v377_v21, %v376_v52  ;;  %v382_v45 = vadd.f32 %v381_v60, %v380_v16  ;;  %v396_v15 = vcombine.low %v360_v2, %v366_v40  ;;  %v411_v24 = vrot.slane %v395_v43, %v1086_v37 }
  0x79   :  { %v383_v25 = vrot.slane %v382_v45, 1  ;;  %v397_v23 = vcombine.low %v372_v44, %v378_v58  ;;  %v418_v49 = vrot.slane %v396_v15, %v1086_v37  ;;  %v426_v62 = vcombine.low %v404_v17, %v411_v24 }
  0x7b   :  { %v384_v38 = vadd.f32 %v383_v25, %v382_v45  ;;  %v425_v26 = vrot.slane %v397_v23, %v1086_v37  ;;  %v434_v30 = vrot.slane %v426_v62, %v1086_v37 }
  0x7d   :  { %v427_v55 = vcombine.low %v418_v49, %v425_v26  ;;  %v449_v3 = vrot.slane %v384_v38, %v1086_v37 }
  0x7f   :  { %v441_v27 = vrot.slane %v427_v55, %v1086_v37  ;;  %v456_v50 = vrot.slane %v449_v3, %v1086_v37 }
  0x81   :  { %v442_v56 = vcombine.low %v434_v30, %v441_v27  ;;  %v460_v39 = vadd.f32 %v456_v50, %v330_v32 }
  0x83   :  { %466 = vst.msk [vmem:[#allocation2 + $0x8] sm:$0x1] %vm765_vm0, %v460_v39  ;;  %v477_v6 = vrot.slane %v442_v56, %v774_v4  ;;  %v481_v28 = vrot.slane %v442_v56, %v777_v5  ;;  %v485_v53 = vrot.slane %v442_v56, %v782_v7  ;;  %v489_v48 = vrot.slane %v442_v56, %v785_v8 }
  0x84   :  { %v493_v22 = vrot.slane %v442_v56, %v788_v9  ;;  %v497_v31 = vrot.slane %v442_v56, %v791_v10  ;;  %v501_v5 = vrot.slane %v442_v56, %v794_v11  ;;  %v505_v8 = vrot.slane %v442_v56, %v797_v12 }
  0x85   :  { %v520_v41 = vsel %vm519_vm1, %v477_v6, 0.0  ;;  %v521_v42 = vsel %vm519_vm1, %v481_v28, 0.0  ;;  %v523_v34 = vsel %vm519_vm1, %v485_v53, 0.0  ;;  %v525_v57 = vsel %vm519_vm1, %v489_v48, 0.0 }
  0x86   :  { %v522_v29 = vadd.f32 %v521_v42, %v520_v41  ;;  %v527_v7 = vsel %vm519_vm1, %v493_v22, 0.0  ;;  %v529_v9 = vsel %vm519_vm1, %v497_v31, 0.0  ;;  %v531_v1 = vsel %vm519_vm1, %v501_v5, 0.0 }
  0x87   :  { %v533_v46 = vsel %vm519_vm1, %v505_v8, 0.0 }
  0x88   :  { %v524_v4 = vadd.f32 %v523_v34, %v522_v29 }
  0x8a   :  { %v526_v51 = vadd.f32 %v525_v57, %v524_v4  ;;  %v564_v13 = vld [vmem:[#allocation2 + $0x8] ss:$0 sm:$0xff] }
  0x8b   :  { %v535_v18 = vsel %vm519_vm1, %v564_v13, 0.0 }
  0x8c   :  { %v528_v0 = vadd.f32 %v527_v7, %v526_v51 }
  0x8e   :  { %v530_v14 = vadd.f32 %v529_v9, %v528_v0 }
  0x90   :  { %v532_v10 = vadd.f32 %v531_v1, %v530_v14 }
  0x92   :  { %v534_v19 = vadd.f32 %v533_v46, %v532_v10 }
  0x94   :  { %v536_v20 = vadd.f32 %v535_v18, %v534_v19 }
  0x96   :  { %537 = vadd.xlane.f32.xlu0 %v536_v20 }
 0x123   :  { %v538_v11 = vpop.xlane.xlu0 %537 }
 0x124   :  { %v539_v59 = vrot.slane %v538_v11, 4 }
 0x126   :  { %v540_v63 = vadd.f32 %v539_v59, %v538_v11 }
 0x128   :  { %v541_v33 = vrot.slane %v540_v63, 2 }
 0x12a   :  { %v542_v12 = vadd.f32 %v541_v33, %v540_v63 }
 0x12c   :  { %v543_v61 = vrot.slane %v542_v12, 1 }
 0x12e   :  { %v544_v35 = vadd.f32 %v543_v61, %v542_v12 }
 0x130   :  { %565 = vpush %v544_v35 }
 0x161   :  { %s566_s21 = spop %565 }
 0x162   :  { %v546_v54 = vstv %s566_s21 }
 0x163   :  { %547 = vst [vmem:[#allocation9] sm:$0xff] %v546_v54 }
 0x164   :  { %686 = shalt.err (!%p683_p0)
}
 0x165   :  { %s687_s25 = scalar_lea.hbm %s1057_s3, 128 }
 0x166   :  { %p688_p1 = scmp.ne.s32.totalorder %s1057_s3, %s687_s25  ;;  %p691_p2 = scmp.lt.u32.totalorder %s687_s25, %s1057_s3 }
 0x168   :  { %p693_p3 = pnand %p691_p2, %p688_p1 }
 0x16a   :  { %696 = shalt.err (!%p693_p3)
}
 0x16b   :  { %557 = dma.vmem_to_hbm [thread:$0]  %s555_s20, 128, %s1057_s3, [#allocation5]  }
 0x16c   :  { %701 = dma.done.wait [#allocation5], 128  }
 0x16d   :  { %702 = vsyncadd [#allocation5], 4294967168 }
 0x16e   :  { %561 = vsyncpa [#allocation4], 1 }
 0x16f   :  { %562 = vsyncpa [#allocation7], 1 }
 0x170   :  { %563 = vsyncpa [#allocation5], 1 }

</bundles_post_ra>
